<compile_context>
chip_gen: v7x
topology: tpu7x:2x2x1
jax: 0.10.0
libtpu: 0.0.40
codegen_flags: <defaults>
</compile_context>

<pallas_src>
import math
import jax
import jax.numpy as jnp
from jax.experimental import pallas as pl
from jax.experimental.pallas import tpu as pltpu


def _round_up(x: int, m: int) -> int:
    return ((x + m - 1) // m) * m


# ---------------------------------------------------------------------------
# Linear (x @ W.T + b) kernel — used for both the in- and out-projection.
# Grid tiles the row (M) axis; the (K, N) weight and (1, N) bias stay resident
# in VMEM across grid steps, every step is one MXU matmul + bias add.
# ---------------------------------------------------------------------------
def _linear_kernel(x_ref, wt_ref, b_ref, o_ref):
    acc = jnp.dot(x_ref[...], wt_ref[...], preferred_element_type=jnp.float32)
    o_ref[...] = (acc + b_ref[...].astype(jnp.float32)).astype(o_ref.dtype)


def _pallas_linear(x: jax.Array, w: jax.Array, b: jax.Array,
                   tile_m: int = 512) -> jax.Array:
    """y = x @ w.T + b   with x:(M,K), w:(N,K), b:(N,) -> (M,N)."""
    M, K = x.shape
    N = w.shape[0]
    wt = w.T                      # (K, N) so the last (lane) dim is the output
    b2 = b.reshape(1, N)

    tm = tile_m if M >= tile_m else _round_up(M, 8)
    m_pad = _round_up(M, tm)
    if m_pad != M:
        x = jnp.pad(x, ((0, m_pad - M), (0, 0)))

    out = pl.pallas_call(
        _linear_kernel,
        out_shape=jax.ShapeDtypeStruct((m_pad, N), x.dtype),
        grid_spec=pltpu.PrefetchScalarGridSpec(
            num_scalar_prefetch=0,
            grid=(m_pad // tm,),
            in_specs=[
                pl.BlockSpec((tm, K), lambda i: (i, 0)),   # row tile of x
                pl.BlockSpec((K, N), lambda i: (0, 0)),    # full weight
                pl.BlockSpec((1, N), lambda i: (0, 0)),    # full bias
            ],
            out_specs=pl.BlockSpec((tm, N), lambda i: (i, 0)),
        ),
        compiler_params=pltpu.CompilerParams(
            dimension_semantics=("parallel",)),
    )(x, wt, b2)
    return out[:M]


# ---------------------------------------------------------------------------
# Flash-style scaled-dot-product attention per head.
# Grid = (num_heads_total, q_tiles, kv_tiles); the KV axis is last and
# "arbitrary" so the f32 VMEM accumulators (m, l, acc) carry across it.
# ---------------------------------------------------------------------------
def _pallas_attention(q: jax.Array, k: jax.Array, v: jax.Array,
                      scale: float) -> jax.Array:
    """q,k,v: (BH, L, hd) -> softmax(scale * q @ k.T) @ v, shape (BH, L, hd)."""
    BH, L, hd = q.shape
    tq = 128 if (L % 128 == 0 and L > 128) else L
    tk = 128 if (L % 128 == 0 and L > 128) else L
    # TODO(synk): pad + mask the KV axis for sequence lengths that are neither
    #             <=128 nor a multiple of 128 (not needed for this module's
    #             small shapes).

    def kernel(q_ref, k_ref, v_ref, o_ref, m_sc, l_sc, acc_sc):
        kv = pl.program_id(2)

        @pl.when(kv == 0)
        def _init():
            m_sc[...] = jnp.full_like(m_sc, -jnp.inf)
            l_sc[...] = jnp.zeros_like(l_sc)
            acc_sc[...] = jnp.zeros_like(acc_sc)

        qb = q_ref[...].astype(jnp.float32) * scale        # (tq, hd)
        kb = k_ref[...].astype(jnp.float32)                # (tk, hd)
        s = jnp.dot(qb, kb.T, preferred_element_type=jnp.float32)  # (tq, tk)

        m_prev = m_sc[...]
        m_new = jnp.maximum(m_prev, s.max(axis=-1, keepdims=True))
        alpha = jnp.exp(m_prev - m_new)
        p = jnp.exp(s - m_new)
        l_sc[...] = alpha * l_sc[...] + p.sum(axis=-1, keepdims=True)
        acc_sc[...] = alpha * acc_sc[...] + jnp.dot(
            p, v_ref[...].astype(jnp.float32),
            preferred_element_type=jnp.float32)
        m_sc[...] = m_new

        @pl.when(kv == pl.num_programs(2) - 1)
        def _finalize():
            o_ref[...] = (acc_sc[...] *
                          pl.reciprocal(l_sc[...], approx=True)
                          ).astype(o_ref.dtype)

    return pl.pallas_call(
        kernel,
        out_shape=jax.ShapeDtypeStruct((BH, L, hd), q.dtype),
        grid_spec=pltpu.PrefetchScalarGridSpec(
            num_scalar_prefetch=0,
            grid=(BH, L // tq, L // tk),
            in_specs=[
                pl.BlockSpec((None, tq, hd), lambda b, i, j: (b, i, 0)),
                pl.BlockSpec((None, tk, hd), lambda b, i, j: (b, j, 0)),
                pl.BlockSpec((None, tk, hd), lambda b, i, j: (b, j, 0)),
            ],
            out_specs=pl.BlockSpec((None, tq, hd), lambda b, i, j: (b, i, 0)),
            scratch_shapes=[
                pltpu.VMEM((tq, 1), jnp.float32),    # running max  m
                pltpu.VMEM((tq, 1), jnp.float32),    # running sum  l
                pltpu.VMEM((tq, hd), jnp.float32),   # output accumulator
            ],
        ),
        compiler_params=pltpu.CompilerParams(
            dimension_semantics=("parallel", "parallel", "arbitrary")),
    )(q, k, v)


# ---------------------------------------------------------------------------
# Full MultiheadAttentionQ.forward
# ---------------------------------------------------------------------------
def multihead_attention_q_forward(query, key, value,
                                  in_proj_weight, in_proj_bias,
                                  out_proj_weight, out_proj_bias,
                                  num_heads: int):
    del key, value  # the PyTorch forward only uses `query` (self-attention)
    L, B, E = query.shape
    H = num_heads
    hd = E // H
    do = out_proj_weight.shape[0]

    # 1) in-projection on the flattened (L*B, E) slab.
    x2d = query.reshape(L * B, E)
    X = _pallas_linear(x2d, in_proj_weight, in_proj_bias)        # (L*B, 3E)

    # 2) split into Q,K,V and lay out heads: (L, B, 3E) -> (B*H, L, hd).
    X3 = X.reshape(L, B, 3 * E)
    Qm, Km, Vm = X3[..., :E], X3[..., E:2 * E], X3[..., 2 * E:]
    q = Qm.reshape(L, B * H, hd).transpose(1, 0, 2)
    k = Km.reshape(L, B * H, hd).transpose(1, 0, 2)
    v = Vm.reshape(L, B * H, hd).transpose(1, 0, 2)

    # 3) scaled-dot-product attention with online softmax.
    heads = _pallas_attention(q, k, v, scale=1.0 / math.sqrt(hd))  # (B*H, L, hd)

    # 4) merge heads and apply the output projection.
    heads2 = heads.transpose(1, 0, 2).reshape(L * B, E)
    y2d = _pallas_linear(heads2, out_proj_weight, out_proj_bias)   # (L*B, do)
    y = y2d.reshape(L, B, do)
    return (y,)   # module returns a 1-tuple


# ---------------------------------------------------------------------------
# Pure-JAX reference (mirrors the PyTorch forward op-for-op).
# ---------------------------------------------------------------------------
def _reference_forward(query, Wi, bi, Wo, bo, num_heads):
    L, B, E = query.shape
    hd = E // num_heads
    X = jnp.einsum("lbe,fe->lbf", query, Wi) + bi
    Qm, Km, Vm = X[..., :E], X[..., E:2 * E], X[..., 2 * E:]
    q = Qm.reshape(L, B * num_heads, hd).transpose(1, 0, 2) / math.sqrt(hd)
    k = Km.reshape(L, B * num_heads, hd).transpose(1, 0, 2)
    v = Vm.reshape(L, B * num_heads, hd).transpose(1, 0, 2)
    attn = jax.nn.softmax(jnp.einsum("bqd,bkd->bqk", q, k), axis=-1)
    heads = jnp.einsum("bqk,bkd->bqd", attn, v)
    heads2 = heads.transpose(1, 0, 2).reshape(L * B, E)
    y = heads2 @ Wo.T + bo
    return y.reshape(L, B, Wo.shape[0])


if __name__ == "__main__":
    key = jax.random.PRNGKey(0)
    kq, kk, kv_, kwi, kbi, kwo, kbo = jax.random.split(key, 7)

    # Small shapes consistent with the module: seq=8, batch=2, embed=32, heads=4.
    L, B, E, H = 8, 2, 32, 4
    query = jax.random.normal(kq, (L, B, E), dtype=jnp.float32)
    key_in = jax.random.normal(kk, (L, B, E), dtype=jnp.float32)
    value_in = jax.random.normal(kv_, (L, B, E), dtype=jnp.float32)
    in_proj_weight = 0.1 * jax.random.normal(kwi, (3 * E, E), dtype=jnp.float32)
    in_proj_bias = 0.1 * jax.random.normal(kbi, (3 * E,), dtype=jnp.float32)
    out_proj_weight = 0.1 * jax.random.normal(kwo, (E, E), dtype=jnp.float32)
    out_proj_bias = 0.1 * jax.random.normal(kbo, (E,), dtype=jnp.float32)

    (y,) = multihead_attention_q_forward(
        query, key_in, value_in,
        in_proj_weight, in_proj_bias,
        out_proj_weight, out_proj_bias,
        num_heads=H)
    y = jax.block_until_ready(y)

    ref = _reference_forward(query, in_proj_weight, in_proj_bias,
                             out_proj_weight, out_proj_bias, H)
    assert y.shape == ref.shape, (y.shape, ref.shape)
    assert jnp.allclose(y, ref, atol=1e-2, rtol=1e-2), "mismatch vs reference MHA"

    print("KERNEL_OK")
</pallas_src>

<mosaic_0001>
module attributes {stable_mosaic.version = 11 : i64} {
  func.func @_linear_kernel(%arg0: i32, %arg1: memref<16x32xf32, #tpu.memory_space<vmem>>, %arg2: memref<32x96xf32, #tpu.memory_space<vmem>>, %arg3: memref<1x96xf32, #tpu.memory_space<vmem>>, %arg4: memref<16x96xf32, #tpu.memory_space<vmem>>) attributes {dimension_semantics = [#tpu.dimension_semantics<parallel>], iteration_bounds = array<i64: 1>, scalar_prefetch = 0 : i64, scratch_operands = 0 : i64, tpu.core_type = #tpu.core_type<tc>, window_params = [{transform_indices = @transform_0, window_bounds = array<i64: 16, 32>}, {pipeline_mode = #tpu.pipeline_mode<synchronous>, transform_indices = @transform_1, window_bounds = array<i64: 32, 96>}, {pipeline_mode = #tpu.pipeline_mode<synchronous>, transform_indices = @transform_2, window_bounds = array<i64: 1, 96>}, {transform_indices = @transform_3, window_bounds = array<i64: 16, 96>}]} {
    %c0 = arith.constant 0 : index
    %c0_0 = arith.constant 0 : index
    %0 = vector.load %arg1[%c0, %c0_0] : memref<16x32xf32, #tpu.memory_space<vmem>>, vector<16x32xf32>
    %c0_1 = arith.constant 0 : index
    %c0_2 = arith.constant 0 : index
    %1 = vector.load %arg2[%c0_1, %c0_2] : memref<32x96xf32, #tpu.memory_space<vmem>>, vector<32x96xf32>
    %cst = arith.constant dense<0.000000e+00> : vector<16x96xf32>
    %2 = tpu.matmul %0, %1, %cst {dimension_numbers = #tpu.dot_dimension_numbers<[1], [0], [0], [1], [0, 0, 1, 1], [], []>} : vector<16x32xf32>, vector<32x96xf32>, vector<16x96xf32> -> vector<16x96xf32>
    %c0_3 = arith.constant 0 : index
    %c0_4 = arith.constant 0 : index
    %3 = vector.load %arg3[%c0_3, %c0_4] : memref<1x96xf32, #tpu.memory_space<vmem>>, vector<1x96xf32>
    %4 = vector.broadcast %3 : vector<1x96xf32> to vector<16x96xf32>
    %5 = arith.addf %2, %4 : vector<16x96xf32>
    %c0_5 = arith.constant 0 : index
    %c0_6 = arith.constant 0 : index
    %6 = vector.load %arg4[%c0_5, %c0_6] : memref<16x96xf32, #tpu.memory_space<vmem>>, vector<16x96xf32>
    tpu.vector_store %arg4[%c0_5, %c0_6], %5 {strides = array<i32>} : memref<16x96xf32, #tpu.memory_space<vmem>>, vector<16x96xf32>,
    return
  }
  func.func @transform_0(%arg0: i32) -> (i32, i32) {
    %c0_i32 = arith.constant 0 : i32
    %c0_i32_0 = arith.constant 0 : i32
    return %arg0, %c0_i32 : i32, i32
  }
  func.func @transform_1(%arg0: i32) -> (i32, i32) {
    %c0_i32 = arith.constant 0 : i32
    %c0_i32_0 = arith.constant 0 : i32
    %c0_i32_1 = arith.constant 0 : i32
    return %c0_i32, %c0_i32_0 : i32, i32
  }
  func.func @transform_2(%arg0: i32) -> (i32, i32) {
    %c0_i32 = arith.constant 0 : i32
    %c0_i32_0 = arith.constant 0 : i32
    %c0_i32_1 = arith.constant 0 : i32
    return %c0_i32, %c0_i32_0 : i32, i32
  }
  func.func @transform_3(%arg0: i32) -> (i32, i32) {
    %c0_i32 = arith.constant 0 : i32
    %c0_i32_0 = arith.constant 0 : i32
    return %arg0, %c0_i32 : i32, i32
  }
}

</mosaic_0001>

<bundles_post_ra>
// kernel: tpu_custom_call.1
= control target key start
LH: loop header
LB: loop body
LE: loop exit
PB: predicated region body
PF: predicated region fallthrough
CT: control target
= control target key end

     0   :  { %8 = vsyncpa [#allocation3], 0  ;;  %s337_s0 = inlined_call_operand.hbm [shape: f32[16,32], index: 0, kind: input, shape index: {}]   ;;  %s338_s1 = inlined_call_operand.hbm [shape: f32[32,96], index: 1, kind: input, shape index: {}]   ;;  %s339_s2 = inlined_call_operand.vmem [shape: f32[1,96], index: 2, kind: input, shape index: {}]   ;;  %s340_s3 = inlined_call_operand.hbm [shape: f32[16,96], index: 3, kind: output, shape index: {}]  }
   0x1   :  { %9 = vsyncpa [#allocation6], 0 }
   0x2   :  { %10 = vsyncpa [#allocation4], 0  ;;  %s264_s12 = smov [#allocation2]   ;;  %s192_s16 = scalar_lea.hbm %s337_s0, 256 }
   0x3   :  { %s16_s13 = sshll.u32 %s264_s12, 4  ;;  %p193_p0 = scmp.ne.s32.totalorder %s337_s0, %s192_s16  ;;  %s17_s13 = int_to_ptr.vmem [resolvable:$true] %s16_s13 }
   0x4   :  { %p196_p1 = scmp.lt.u32.totalorder %s192_s16, %s337_s0 }
   0x6   :  { %p198_p2 = pnand %p196_p1, %p193_p0 }
   0x8   :  { %201 = shalt.err (!%p198_p2)
}
   0x9   :  { %s202_s21 = scalar_lea.vmem %s17_s13, 256  ;;  %p207_p4 = scmp.lt.s32.totalorder %s17_s13, %s17_s13 }
   0xa   :  { %p203_p3 = scmp.ne.s32.totalorder %s17_s13, %s202_s21  ;;  %p208_p5 = scmp.lt.s32.totalorder %s202_s21, %s202_s21 }
   0xc   :  { %p209_p6 = por %p208_p5, %p207_p4 }
   0xe   :  { %p210_p7 = pnand %p209_p6, %p203_p3 }
  0x10   :  { %213 = shalt.err (!%p210_p7)
}
  0x11   :  { %s265_s22 = smov 128   ;;  %s266_s23 = smov 8  }
  0x12   :  { %22 = dma.hbm_to_vmem [thread:$0]  %s337_s0, 256, %s17_s13, [#allocation3], %s265_s22, %s265_s22, %s266_s23  }
  0x13   :  { %s267_s26 = smov [#allocation5]   ;;  %s214_s30 = scalar_lea.hbm %s338_s1, 512 }
  0x14   :  { %s28_s27 = sshll.u32 %s267_s26, 4  ;;  %p215_p8 = scmp.ne.s32.totalorder %s338_s1, %s214_s30  ;;  %s29_s27 = int_to_ptr.vmem [resolvable:$true] %s28_s27 }
  0x15   :  { %p218_p9 = scmp.lt.u32.totalorder %s214_s30, %s338_s1 }
  0x17   :  { %p220_p10 = pnand %p218_p9, %p215_p8 }
  0x19   :  { %223 = shalt.err (!%p220_p10)
}
  0x1a   :  { %s224_s8 = scalar_lea.vmem %s29_s27, 512  ;;  %p229_p12 = scmp.lt.s32.totalorder %s29_s27, %s29_s27 }
  0x1b   :  { %p225_p11 = scmp.ne.s32.totalorder %s29_s27, %s224_s8  ;;  %p230_p13 = scmp.lt.s32.totalorder %s224_s8, %s224_s8 }
  0x1d   :  { %p231_p0 = por %p230_p13, %p229_p12 }
  0x1f   :  { %p232_p1 = pnand %p231_p0, %p225_p11 }
  0x21   :  { %235 = shalt.err (!%p232_p1)
}
  0x22   :  { %34 = dma.hbm_to_vmem [thread:$0]  %s338_s1, 512, %s29_s27, [#allocation6], %s265_s22, %s265_s22, %s266_s23  }
  0x23   :  { %258 = dma.done.wait [#allocation3], 256  }
  0x24   :  { %259 = vsyncadd [#allocation3], 4294967040 }
  0x25   :  { %260 = dma.done.wait [#allocation6], 512  }
  0x26   :  { %261 = vsyncadd [#allocation6], 4294966784  ;;  %vm56_vm0 = vcmask 261120   ;;  %v45_v0 = vld [vmem:[#allocation5] sm:$0xff]  ;;  %v46_v1 = vld [vmem:[#allocation5 + $0x8] sm:$0xff]  ;;  %s268_s11 = smov [#allocation7]  }
  0x27   :  { %v47_v2 = vld [vmem:[#allocation5 + $0x10] sm:$0xff]  ;;  %v179_v3 = vpack.c.bf16 %v46_v1, %v45_v0  ;;  %v48_v4 = vld [vmem:[#allocation5 + $0x18] sm:$0xff]  ;;  %s146_s12 = sshll.u32 %s268_s11, 4  ;;  %vm138_vm1 = vcmask 785408   ;;  %s147_s12 = int_to_ptr.vmem [resolvable:$true] %s146_s12 }
  0x28   :  { %v43_v5 = vld [vmem:[#allocation2] sm:$0xff]  ;;  %v183_v6 = vpack.c.bf16 %v48_v4, %v47_v2  ;;  %v44_v7 = vld [vmem:[#allocation2 + $0x8] sm:$0xff]  ;;  %s236_s13 = scalar_lea.vmem %s147_s12, 256  ;;  %p241_p3 = scmp.lt.s32.totalorder %s147_s12, %s147_s12 }
  0x29   :  { %176 = vmatprep.mubr.msk.f32.mxu0 %vm56_vm0, %v43_v5  ;;  %180 = vmatprep.subr.bf16.mxu0 %v179_v3  ;;  %v159_v8 = vld [vmem:[%s339_s2] ss:$0 sm:$0xff]  ;;  %p237_p2 = scmp.ne.s32.totalorder %s147_s12, %s236_s13  ;;  %p242_p4 = scmp.lt.s32.totalorder %s236_s13, %s236_s13 }
  0x2a   :  { %182 = vmatpush3.bf16.msra.mxu0 %v179_v3 }
  0x2b   :  { %184 = vmatprep.subr.bf16.mxu0 %v183_v6  ;;  %p243_p5 = por %p242_p4, %p241_p3 }
  0x2d   :  { %p244_p6 = pnand %p243_p5, %p237_p2 }
  0x2e   :  { %186 = vmatpush3.bf16.msra.mxu0 %v183_v6 }
  0x31   :  { %177 = vmatmul.mubr.msk.f32.vlgmr.msra.gmra.mrb[0].mxu0 %vm56_vm0, %v44_v7 }
 0x104   :  { %v178_v9 = vpop.f32.mrb[0].mxu0 }
 0x105   :  { %v135_v10 = vadd.f32 %v178_v9, %v159_v8  ;;  %v129_v11 = vpop.f32.mrb[1].mxu0 }
 0x106   :  { %v130_v12 = vadd.f32 %v159_v8, %v129_v11 }
 0x107   :  { %140 = vst.msk [vmem:[#allocation7 + $0x8] sm:$0xff] %vm138_vm1, %v135_v10 }
 0x108   :  { %139 = vst.msk [vmem:[#allocation7] sm:$0xff] %vm138_vm1, %v130_v12 }
 0x109   :  { %247 = shalt.err (!%p244_p6)
}
 0x10a   :  { %s248_s2 = scalar_lea.hbm %s340_s3, 256 }
 0x10b   :  { %p249_p7 = scmp.ne.s32.totalorder %s340_s3, %s248_s2  ;;  %p252_p8 = scmp.lt.u32.totalorder %s248_s2, %s340_s3 }
 0x10d   :  { %p254_p9 = pnand %p252_p8, %p249_p7 }
 0x10f   :  { %257 = shalt.err (!%p254_p9)
}
 0x110   :  { %152 = dma.vmem_to_hbm [thread:$0]  %s147_s12, 256, %s340_s3, [#allocation4], %s265_s22, %s265_s22, %s266_s23  }
 0x111   :  { %262 = dma.done.wait [#allocation4], 256  }
 0x112   :  { %263 = vsyncadd [#allocation4], 4294967040 }
 0x113   :  { %156 = vsyncpa [#allocation3], 1 }
 0x114   :  { %157 = vsyncpa [#allocation6], 1 }
 0x115   :  { %158 = vsyncpa [#allocation4], 1 }

</bundles_post_ra>
